<compile_context>
chip_gen: v7x
topology: tpu7x:2x2x1
jax: 0.10.0
libtpu: 0.0.40
codegen_flags: <defaults>
</compile_context>

<pallas_src>
import jax
import jax.numpy as jnp
from jax.experimental import pallas as pl
from jax.experimental.pallas import tpu as pltpu

_LANES = 128
_SUBLANES = 8


def _cdiv(a, b):
    return -(-a // b)


# --------------------------------------------------------------------------
# forward(): identity.  No pallas_call — a copy kernel would be pure overhead.
# --------------------------------------------------------------------------
def vae_decoder_forward(x):
    """VAEDecoder.forward is the identity map."""
    return x


# --------------------------------------------------------------------------
# recon_loss(): global SSE reduction kernel.
# --------------------------------------------------------------------------
def _sse_partial_kernel(p_ref, t_ref, out_ref):
    # p_ref/t_ref: (block_groups, 8, 128) tiles; out_ref: (1, 8, 128) f32
    # accumulator, resident across the trailing (reduction) grid axis.
    k = pl.program_id(1)

    @pl.when(k == 0)
    def _():
        out_ref[...] = jnp.zeros_like(out_ref)

    d = p_ref[...].astype(jnp.float32) - t_ref[...].astype(jnp.float32)
    # Reduce over the leading (block-group) axis only: vreg-wise VPU adds,
    # no XLU cross-lane work in the steady state.
    out_ref[...] += jnp.sum(d * d, axis=0, keepdims=True)


def _plan_reduction(n_elements, block_bytes, num_splits):
    """Lane/sublane-dense tiling: view arrays as [groups_total, 8, 128];
    each grid step consumes `block_groups` groups."""
    rows = _cdiv(n_elements, _LANES)
    # ~block_bytes of f32 per input block, rounded to whole (8,128) groups.
    max_block_rows = max(_SUBLANES,
                         (block_bytes // (_LANES * 4)) // _SUBLANES * _SUBLANES)
    rows_per_split = _cdiv(rows, num_splits)
    block_rows = min(max_block_rows,
                     _cdiv(rows_per_split, _SUBLANES) * _SUBLANES)
    steps = _cdiv(rows, num_splits * block_rows)
    block_groups = block_rows // _SUBLANES
    groups_total = num_splits * steps * block_groups
    return groups_total, block_groups, steps


def vae_decoder_recon_loss(targets, predictions, *, reduction="sum", mask=None,
                           block_bytes=2 * 1024 * 1024, num_splits=2):
    """Equivalent of VAEDecoder.recon_loss with recon_function=F.mse_loss.

    targets, predictions: same shape, leading dim = batch B (e.g. NCHW).
    reduction='sum'  -> sum over batch of per-sample SSE  (= global SSE)
    reduction='mean' -> mean over batch of per-sample SSE (= global SSE / B)
    Returns a float32 scalar.
    """
    if mask is not None:
        # TODO(synk): boolean-mask gather (targets[:, mask]) needs a DMA-gather
        # kernel; not implemented in the Pallas path.
        raise NotImplementedError("mask is not supported in the Pallas path")
    assert targets.shape == predictions.shape, "shape mismatch"

    B = targets.shape[0]
    n = int(targets.size)

    groups_total, block_groups, steps = _plan_reduction(
        n, block_bytes, num_splits)
    n_pad = groups_total * _SUBLANES * _LANES

    t = targets.reshape(-1)
    p = predictions.reshape(-1)
    if n_pad != n:
        # Zero-pad BOTH tensors identically: padded lanes contribute 0 to SSE.
        t = jnp.pad(t, (0, n_pad - n))
        p = jnp.pad(p, (0, n_pad - n))
    t3 = t.reshape(groups_total, _SUBLANES, _LANES)
    p3 = p.reshape(groups_total, _SUBLANES, _LANES)

    in_map = lambda c, k: (c * steps + k, 0, 0)

    partials = pl.pallas_call(
        _sse_partial_kernel,
        out_shape=jax.ShapeDtypeStruct((num_splits, _SUBLANES, _LANES),
                                       jnp.float32),
        grid_spec=pltpu.PrefetchScalarGridSpec(
            num_scalar_prefetch=0,
            grid=(num_splits, steps),
            in_specs=[
                pl.BlockSpec((block_groups, _SUBLANES, _LANES), in_map),
                pl.BlockSpec((block_groups, _SUBLANES, _LANES), in_map),
            ],
            out_specs=pl.BlockSpec((1, _SUBLANES, _LANES),
                                   lambda c, k: (c, 0, 0)),
        ),
        compiler_params=pltpu.CompilerParams(
            # leading axis -> megacore split on v7x; trailing -> reduction
            dimension_semantics=("parallel", "arbitrary")),
    )(p3, t3)

    # Single tiny cross-lane reduction outside the kernel (num_splits*1024 f32).
    loss = jnp.sum(partials)
    if reduction != "sum":
        loss = loss / B
    return loss


# --------------------------------------------------------------------------
if __name__ == "__main__":
    key = jax.random.PRNGKey(0)
    k1, k2, k3, k4 = jax.random.split(key, 4)

    # Small NCHW inputs consistent with a VAE decoder output / target pair.
    B, C, H, W = 2, 4, 16, 16
    x = jax.random.normal(k1, (B, C, H, W), dtype=jnp.float32)
    targets = jax.random.normal(k2, (B, C, H, W), dtype=jnp.float32)

    # forward(): identity (no kernel launch).
    y = vae_decoder_forward(x)
    y = jax.block_until_ready(y)
    assert y.shape == x.shape and y.dtype == x.dtype
    assert bool(jnp.allclose(y, x)), "forward identity mismatch"

    # recon_loss(): sum over features of squared error, then sum over batch.
    loss_sum = jax.block_until_ready(
        vae_decoder_recon_loss(targets, y, reduction="sum"))
    ref_sum = jnp.sum(
        jnp.sum((y.reshape(B, -1) - targets.reshape(B, -1)) ** 2, axis=-1),
        axis=0)
    assert bool(jnp.allclose(loss_sum, ref_sum, rtol=1e-5, atol=1e-5)), \
        f"recon_loss(sum) mismatch: {loss_sum} vs {ref_sum}"

    # 'mean' reduction path (mean over batch of per-sample SSE, like the
    # PyTorch module's r_loss.mean(dim=0)).
    loss_mean = jax.block_until_ready(
        vae_decoder_recon_loss(targets, y, reduction="mean"))
    ref_mean = jnp.mean(
        jnp.sum((y.reshape(B, -1) - targets.reshape(B, -1)) ** 2, axis=-1),
        axis=0)
    assert bool(jnp.allclose(loss_mean, ref_mean, rtol=1e-5, atol=1e-5)), \
        f"recon_loss(mean) mismatch: {loss_mean} vs {ref_mean}"

    # Ragged shape (C*H*W not a multiple of 128): exercises the padded tail.
    xr = jax.random.normal(k3, (2, 3, 5, 7), dtype=jnp.float32)
    tr = jax.random.normal(k4, (2, 3, 5, 7), dtype=jnp.float32)
    loss_r = jax.block_until_ready(
        vae_decoder_recon_loss(tr, xr, reduction="sum"))
    ref_r = jnp.sum(
        jnp.sum((xr.reshape(2, -1) - tr.reshape(2, -1)) ** 2, axis=-1), axis=0)
    assert bool(jnp.allclose(loss_r, ref_r, rtol=1e-5, atol=1e-5)), \
        f"recon_loss(ragged) mismatch: {loss_r} vs {ref_r}"

    print("KERNEL_OK")
</pallas_src>

<mosaic_0001>
module attributes {stable_mosaic.version = 11 : i64} {
  func.func @_sse_partial_kernel(%arg0: i32, %arg1: i32, %arg2: memref<1x8x128xf32, #tpu.memory_space<vmem>>, %arg3: memref<1x8x128xf32, #tpu.memory_space<vmem>>, %arg4: memref<1x8x128xf32, #tpu.memory_space<vmem>>) attributes {dimension_semantics = [#tpu.dimension_semantics<parallel>, #tpu.dimension_semantics<arbitrary>], iteration_bounds = array<i64: 2, 1>, scalar_prefetch = 0 : i64, scratch_operands = 0 : i64, tpu.core_type = #tpu.core_type<tc>, window_params = [{transform_indices = @transform_0, window_bounds = array<i64: 1, 8, 128>}, {transform_indices = @transform_1, window_bounds = array<i64: 1, 8, 128>}, {transform_indices = @transform_2, window_bounds = array<i64: 1, 8, 128>}]} {
    %c0_i32 = arith.constant 0 : i32
    %0 = arith.cmpi eq, %arg1, %c0_i32 : i32
    %1 = arith.extui %0 : i1 to i32
    %c0_i32_0 = arith.constant 0 : i32
    %2 = arith.cmpi ne, %1, %c0_i32_0 : i32
    scf.if %2 {
      %cst_12 = arith.constant 0.000000e+00 : f32
      %12 = vector.broadcast %cst_12 : f32 to vector<1x8x128xf32>
      %c0_13 = arith.constant 0 : index
      %c0_14 = arith.constant 0 : index
      %c0_15 = arith.constant 0 : index
      %13 = vector.load %arg4[%c0_13, %c0_14, %c0_15] : memref<1x8x128xf32, #tpu.memory_space<vmem>>, vector<1x8x128xf32>
      tpu.vector_store %arg4[%c0_13, %c0_14, %c0_15], %12 {strides = array<i32>} : memref<1x8x128xf32, #tpu.memory_space<vmem>>, vector<1x8x128xf32>,
    } else {
    }
    %c0 = arith.constant 0 : index
    %c0_1 = arith.constant 0 : index
    %c0_2 = arith.constant 0 : index
    %3 = vector.load %arg2[%c0, %c0_1, %c0_2] : memref<1x8x128xf32, #tpu.memory_space<vmem>>, vector<1x8x128xf32>
    %c0_3 = arith.constant 0 : index
    %c0_4 = arith.constant 0 : index
    %c0_5 = arith.constant 0 : index
    %4 = vector.load %arg3[%c0_3, %c0_4, %c0_5] : memref<1x8x128xf32, #tpu.memory_space<vmem>>, vector<1x8x128xf32>
    %5 = arith.subf %3, %4 : vector<1x8x128xf32>
    %c0_6 = arith.constant 0 : index
    %c0_7 = arith.constant 0 : index
    %c0_8 = arith.constant 0 : index
    %6 = vector.load %arg4[%c0_6, %c0_7, %c0_8] : memref<1x8x128xf32, #tpu.memory_space<vmem>>, vector<1x8x128xf32>
    %7 = arith.mulf %5, %5 : vector<1x8x128xf32>
    %cst = arith.constant dense<0.000000e+00> : vector<8x128xf32>
    %8 = vector.multi_reduction <add>, %7, %cst [0] : vector<1x8x128xf32> to vector<8x128xf32>
    %9 = vector.shape_cast %8 : vector<8x128xf32> to vector<1x8x128xf32>
    %10 = arith.addf %6, %9 : vector<1x8x128xf32>
    %c0_9 = arith.constant 0 : index
    %c0_10 = arith.constant 0 : index
    %c0_11 = arith.constant 0 : index
    %11 = vector.load %arg4[%c0_9, %c0_10, %c0_11] : memref<1x8x128xf32, #tpu.memory_space<vmem>>, vector<1x8x128xf32>
    tpu.vector_store %arg4[%c0_9, %c0_10, %c0_11], %10 {strides = array<i32>} : memref<1x8x128xf32, #tpu.memory_space<vmem>>, vector<1x8x128xf32>,
    return
  }
  func.func @transform_0(%arg0: i32, %arg1: i32) -> (i32, i32, i32) {
    %c1_i32 = arith.constant 1 : i32
    %0 = arith.muli %arg0, %c1_i32 : i32
    %1 = arith.addi %0, %arg1 : i32
    %c0_i32 = arith.constant 0 : i32
    %c0_i32_0 = arith.constant 0 : i32
    %c0_i32_1 = arith.constant 0 : i32
    return %1, %c0_i32, %c0_i32_0 : i32, i32, i32
  }
  func.func @transform_1(%arg0: i32, %arg1: i32) -> (i32, i32, i32) {
    %c1_i32 = arith.constant 1 : i32
    %0 = arith.muli %arg0, %c1_i32 : i32
    %1 = arith.addi %0, %arg1 : i32
    %c0_i32 = arith.constant 0 : i32
    %c0_i32_0 = arith.constant 0 : i32
    %c0_i32_1 = arith.constant 0 : i32
    return %1, %c0_i32, %c0_i32_0 : i32, i32, i32
  }
  func.func @transform_2(%arg0: i32, %arg1: i32) -> (i32, i32, i32) {
    %c0_i32 = arith.constant 0 : i32
    %c0_i32_0 = arith.constant 0 : i32
    %c0_i32_1 = arith.constant 0 : i32
    return %arg0, %c0_i32, %c0_i32_0 : i32, i32, i32
  }
}

</mosaic_0001>

<bundles_post_ra>
// kernel: tpu_custom_call.1
= control target key start
LH: loop header
LB: loop body
LE: loop exit
PB: predicated region body
PF: predicated region fallthrough
CT: control target
= control target key end

     0   :  { %7 = vsyncpa [#allocation3], 0  ;;  %s816_s0 = inlined_call_operand.hbm [shape: f32[2,8,128], index: 0, kind: input, shape index: {}]   ;;  %s817_s1 = inlined_call_operand.hbm [shape: f32[2,8,128], index: 1, kind: input, shape index: {}]   ;;  %s818_s2 = inlined_call_operand.hbm [shape: f32[2,8,128], index: 2, kind: output, shape index: {}]  }
   0x1   :  { %9 = vsyncpa [#allocation3 + $0x1], 0 }
   0x2   :  { %10 = vsyncpa [#allocation6], 0 }
   0x3   :  { %12 = vsyncpa [#allocation6 + $0x1], 0 }
   0x4   :  { %13 = vsyncpa [#allocation4], 0 }
   0x5   :  { %15 = vsyncpa [#allocation4 + $0x1], 0  ;;  %s596_s9 = smov 0   ;;  %s598_s10 = smov 0  }
   0x6   :  { %s600_s11 = smov 0   ;;  %s602_s12 = smov 0  }
   0x7   :  { %s604_s13 = smov 0   ;;  %s606_s14 = smov 0  }
   0x8 LB: > { %s346_s15 = sadd.s32 4294967295, %s576_s14   ;;  %s347_s16 = sadd.s32 4294967294, %s576_s14   ;;  %s576_s14 = sphi %s606_s14, %s21_s14   ;;  %s572_s13 = sphi %s604_s13, %s838_s13   ;;  %s568_s12 = sphi %s602_s12, %s837_s12   ;;  %s564_s11 = sphi %s600_s11, %s836_s11   ;;  %s560_s10 = sphi %s598_s10, %s835_s10   ;;  %s556_s9 = sphi %s596_s9, %s834_s9  }
   0x9   : > { %s33_s17 = sadd.s32 1, %s572_s13  ;;  %s42_s18 = sadd.s32 1, %s564_s11 }
   0xa   : > { %p35_p0 = scmp.ge.s32.totalorder %s33_s17, 2  ;;  %p49_p1 = scmp.ne.s32.totalorder %s564_s11, %s560_s10 }
   0xb   : > { %p50_p2 = scmp.eq.s32.totalorder %s576_s14, 0  ;;  %p55_p3 = scmp.ne.s32.totalorder %s560_s10, %s556_s9 }
   0xc   : > { %s840_s17 = smov (%p35_p0, %s33_s17), 0  ;;  %p56_p5 = scmp.eq.s32.totalorder %s346_s15, 0 }
   0xd   : > { %p637_p4 = por %p50_p2, %p49_p1  ;;  %s39_s20 = ssub.s32 %s572_s13, %s840_s17 }
   0xe   : > { %p107_p6 = scmp.eq.s32.totalorder %s346_s15, 1  ;;  %p40_p7 = scmp.eq.s32.totalorder %s39_s20, 0 }
   0xf   : > { %p643_p8 = por %p56_p5, %p55_p3  ;;  %p113_p10 = scmp.eq.s32.totalorder %s347_s16, 1 }
  0x10   : > { %p647_p9 = por %p107_p6, %p49_p1  ;;  %p379_p13 = scmp.lt.s32.totalorder %s576_s14, 2 }
  0x11   : > { %s822_s21 = scalar_select %p643_p8, 1, 0 }
  0x12   : > { %s823_s22 = scalar_select %p647_p9, 1, 0 }
  0x13   : > { %s652_s23 = scalar_select %p40_p7, %s564_s11, %s42_s18  }
  0x14   : > { %p654_p11 = por %p113_p10, %p55_p3  ;;  %s661_s25 = sand.u32 1, %s564_s11  }
  0x15   : > { %s350_s26 = sshll.u32 %s661_s25, 3  ;;  %s351_s27 = sshll.u32 %s572_s13, 7 }
  0x16   : > { %s824_s24 = scalar_select %p654_p11, 1, 0 }
  0x17   : > { %s670_s30 = scalar_lea.hbm %s816_s0, %s351_s27  ;;  %s137_s3 = scalar_lea.vmem [#allocation2], %s350_s26 }
  0x18   : > { %s145_s4 = sshll.u32 %s137_s3, 4  ;;  %p678_p0 = pnand %p379_p13, %p637_p4  ;;  %s674_s4 = int_to_ptr.vmem [resolvable:$true] %s145_s4 }
  0x19   : > { %s134_s6 = scalar_lea.sflag [#allocation3], %s661_s25  ;;  %s430_s7 = scalar_lea.hbm %s670_s30, 128 }
  0x1a   : > { %p431_p3 = scmp.ne.s32.totalorder %s670_s30, %s430_s7  ;;  %p432_p5 = pneg %p678_p0 }
  0x1b   : > { %s435_s16 = scalar_lea.hbm %s816_s0, 256  ;;  %p436_p4 = scmp.lt.u32.totalorder %s670_s30, %s816_s0 }
  0x1c   : > { %p433_p6 = pnand %p432_p5, %p431_p3  ;;  %p437_p10 = scmp.lt.u32.totalorder %s435_s16, %s430_s7 }
  0x1d   : > { %p439_p12 = scmp.lt.u32.totalorder %s430_s7, %s670_s30 }
  0x1e   : > { %p434_p7 = pneg %p433_p6  ;;  %p438_p13 = por %p437_p10, %p436_p4 }
  0x20   : > { %p440_p1 = por %p439_p12, %p438_p13 }
  0x22   : > { %p441_p2 = pnand %p440_p1, %p434_p7 }
  0x24   : > { %444 = shalt.err (!%p441_p2)
}
  0x25   : > { %s445_s20 = scalar_lea.vmem %s674_s4, 128  ;;  %s578_s28 = smov [#allocation2]  }
  0x26   : > { %p446_p3 = scmp.ne.s32.totalorder %s674_s4, %s445_s20  ;;  %s450_s29 = sshll.u32 %s578_s28, 4  ;;  %s451_s29 = int_to_ptr.vmem [resolvable:$false] %s450_s29 }
  0x27   : > { %s452_s3 = scalar_lea.vmem %s451_s29, 256  ;;  %p453_p9 = scmp.lt.s32.totalorder %s674_s4, %s451_s29 }
  0x28   : > { %p448_p6 = pnand %p446_p3, %p432_p5  ;;  %p454_p4 = scmp.lt.s32.totalorder %s452_s3, %s445_s20 }
  0x2a   : > { %p449_p11 = pneg %p448_p6  ;;  %p455_p10 = por %p454_p4, %p453_p9 }
  0x2c   : > { %p456_p12 = pnand %p455_p10, %p449_p11 }
  0x2e   : > { %459 = shalt.err (!%p456_p12)
}
  0x2f   : > { %371 = dma.hbm_to_vmem [thread:$0]  (!%p678_p0), %s670_s30, 128, %s674_s4, %s134_s6  }
  0x30   : > { %p826_p1 = scmp.lt.s32.totalorder %s576_s14, 3  ;;  %p827_p2 = scmp.ge.s32.totalorder %s576_s14, 1 }
  0x31   : > { %s723_s16 = scalar_lea.hbm %s817_s1, %s351_s27  ;;  %s156_s18 = scalar_lea.vmem [#allocation5], %s350_s26 }
  0x32   : > { %p714_p7 = pnand %p827_p2, %p826_p1  ;;  %s164_s19 = sshll.u32 %s156_s18, 4  ;;  %s165_s19 = int_to_ptr.vmem [resolvable:$true] %s164_s19 }
  0x33   : > { %s153_s30 = scalar_lea.sflag [#allocation6], %s661_s25  ;;  %s460_s4 = scalar_lea.hbm %s723_s16, 128 }
  0x34   : > { %s828_s7 = scalar_select %p714_p7, 1, 0 }
  0x35   : > { %p461_p9 = scmp.ne.s32.totalorder %s723_s16, %s460_s4  ;;  %s465_s27 = scalar_lea.hbm %s817_s1, 256 }
  0x36   : > { %p466_p3 = scmp.lt.u32.totalorder %s723_s16, %s817_s1  ;;  %p467_p6 = scmp.lt.u32.totalorder %s465_s27, %s460_s4 }
  0x37   : > { %p463_p11 = pnand %p461_p9, %p432_p5  ;;  %p469_p10 = scmp.lt.u32.totalorder %s460_s4, %s723_s16 }
  0x38   : > { %p468_p4 = por %p467_p6, %p466_p3 }
  0x39   : > { %p464_p13 = pneg %p463_p11 }
  0x3a   : > { %p470_p12 = por %p469_p10, %p468_p4 }
  0x3c   : > { %p471_p1 = pnand %p470_p12, %p464_p13 }
  0x3e   : > { %474 = shalt.err (!%p471_p1)
}
  0x3f   : > { %s475_s25 = scalar_lea.vmem %s165_s19, 128  ;;  %s579_s26 = smov [#allocation5]  }
  0x40   : > { %p476_p2 = scmp.ne.s32.totalorder %s165_s19, %s475_s25  ;;  %s480_s3 = sshll.u32 %s579_s26, 4  ;;  %s481_s3 = int_to_ptr.vmem [resolvable:$false] %s480_s3 }
  0x41   : > { %s482_s8 = scalar_lea.vmem %s481_s3, 256  ;;  %p483_p8 = scmp.lt.s32.totalorder %s165_s19, %s481_s3 }
  0x42   : > { %p478_p9 = pnand %p476_p2, %p432_p5  ;;  %p484_p7 = scmp.lt.s32.totalorder %s482_s8, %s475_s25 }
  0x44   : > { %p479_p11 = pneg %p478_p9  ;;  %p485_p3 = por %p484_p7, %p483_p8 }
  0x46   : > { %p486_p6 = pnand %p485_p3, %p479_p11 }
  0x48   : > { %489 = shalt.err (!%p486_p6)
}
  0x49   : > { %374 = dma.hbm_to_vmem [thread:$0]  (!%p678_p0), %s723_s16, 128, %s165_s19, %s153_s30  }
  0x4a   : > { %p829_p13 = scmp.ne.s32.totalorder %s828_s7, 0 }
  0x4b   : > { %s750_s15 = sand.u32 (!%p829_p13), 1, %s560_s10   ;;  %p830_p5 = scmp.ne.s32.totalorder (!%p829_p13), %s822_s21, 0 }
  0x4c   : > { %173 = sbr.rel (%p829_p13) target bundleno = 112 (0x70), region = 28  ;;  %s355_s18 = sshll.u32 (!%p829_p13), %s750_s15, 3 }
  0x4d   : > { %s176_s4 = scalar_lea.sflag (!%p829_p13), [#allocation3], %s750_s15  ;;  %s179_s6 = scalar_lea.vmem (!%p829_p13), [#allocation2], %s355_s18 }
  0x53   : > { %543 = dma.done.wait (%p830_p5), %s176_s4, 128  }
  0x54   : > { %545 = vsyncadd (%p830_p5), %s176_s4, 4294967168  ;;  %s185_s5 = scalar_lea.sflag [#allocation6], %s750_s15  ;;  %s188_s16 = scalar_lea.vmem [#allocation5], %s355_s18 }
  0x55   : > { %547 = dma.done.wait (%p830_p5), %s185_s5, 128  }
  0x56   : > { %549 = vsyncadd (%p830_p5), %s185_s5, 4294967168  ;;  %v221_v0 = vld [vmem:[%s179_s6] sm:$0xff]  ;;  %v222_v1 = vld [vmem:[%s188_s16] sm:$0xff]  ;;  %s359_s7 = sshll.u32 %s568_s12, 7  ;;  %s213_s19 = scalar_lea.vmem [#allocation7], %s355_s18 }
  0x57   : > { %v223_v2 = vsub.f32 %v221_v0, %v222_v1  ;;  %s243_s30 = sshll.u32 %s213_s19, 4  ;;  %s767_s28 = scalar_lea.hbm %s818_s2, %s359_s7  ;;  %s769_s30 = int_to_ptr.vmem [resolvable:$true] %s243_s30 }
  0x58   : > { %s230_s21 = scalar_lea.sflag [#allocation4], %s750_s15  ;;  %s490_s29 = scalar_lea.vmem %s769_s30, 128 }
  0x59   : > { %v225_v3 = vmul.f32 %v223_v2, %v223_v2  ;;  %p491_p8 = scmp.ne.s32.totalorder %s769_s30, %s490_s29  ;;  %p831_p0 = scmp.ne.s32.totalorder %s823_s22, 0 }
  0x5a   : > { %s580_s12 = smov [#allocation7]  }
  0x5b   : > { %228 = vst [vmem:[%s213_s19] sm:$0xff] %v225_v3  ;;  %p492_p7 = pnand %p491_p8, %p831_p0  ;;  %s494_s25 = sshll.u32 %s580_s12, 4  ;;  %s495_s25 = int_to_ptr.vmem [resolvable:$false] %s494_s25 }
  0x5c   : > { %s496_s26 = scalar_lea.vmem %s495_s25, 256  ;;  %p497_p10 = scmp.lt.s32.totalorder %s769_s30, %s495_s25 }
  0x5d   : > { %p493_p4 = pneg %p492_p7  ;;  %p498_p12 = scmp.lt.s32.totalorder %s496_s26, %s490_s29 }
  0x5f   : > { %p499_p1 = por %p498_p12, %p497_p10 }
  0x61   : > { %p500_p2 = pnand %p499_p1, %p493_p4 }
  0x63   : > { %503 = shalt.err (!%p500_p2)
}
  0x64   : > { %s504_s3 = scalar_lea.hbm %s767_s28, 128  ;;  %s508_s18 = scalar_lea.hbm %s818_s2, 256 }
  0x65   : > { %p505_p9 = scmp.ne.s32.totalorder %s767_s28, %s504_s3  ;;  %p509_p6 = scmp.lt.u32.totalorder %s767_s28, %s818_s2 }
  0x66   : > { %p510_p13 = scmp.lt.u32.totalorder %s508_s18, %s504_s3  ;;  %p512_p8 = scmp.lt.u32.totalorder %s504_s3, %s767_s28 }
  0x67   : > { %p506_p11 = pnand %p505_p9, %p831_p0 }
  0x68   : > { %p511_p5 = por %p510_p13, %p509_p6 }
  0x69   : > { %p507_p3 = pneg %p506_p11 }
  0x6a   : > { %p513_p7 = por %p512_p8, %p511_p5 }
  0x6c   : > { %p514_p4 = pnand %p513_p7, %p507_p3 }
  0x6e   : > { %517 = shalt.err (!%p514_p4)
}
  0x6f   : > { %366 = dma.vmem_to_hbm [thread:$0]  (%p831_p0), %s769_s30, 128, %s767_s28, %s230_s21  }
  0x70 PF: > { %s255_s5 = sand.u32 1, %s556_s9   ;;  %p832_p10 = scmp.ne.s32.totalorder %s824_s24, 0 }
  0x71   : > { %p833_p12 = scmp.ge.s32.totalorder %s576_s14, 2  ;;  %s256_s16 = scalar_lea.sflag [#allocation4], %s255_s5 }
  0x73   : > { %p376_p1 = pnand %p833_p12, %p832_p10 }
  0x75   : > { %551 = dma.done.wait (!%p376_p1), %s256_s16, 128  }
  0x76   : > { %553 = vsyncadd (!%p376_p1), %s256_s16, 4294967168  ;;  %s21_s14 = sadd.s32 1, %s576_s14   ;;  %s834_s9 = smov %s560_s10 }
  0x77   : > { %p18_p2 = scmp.ge.s32.totalorder %s21_s14, 4   ;;  %s835_s10 = smov %s564_s11 }
  0x78   : > { %s836_s11 = smov %s652_s23  ;;  %s837_s12 = smov %s572_s13 }
  0x79   : > { %s838_s13 = smov %s840_s17  ;;  %20 = sbr.rel (!%p18_p2) target bundleno = 8 (0x8), region = 90 }
  0x80   :  { %261 = vsyncpa [#allocation3], 1 }
  0x81   :  { %263 = vsyncpa [#allocation3 + $0x1], 1 }
  0x82   :  { %264 = vsyncpa [#allocation6], 1 }
  0x83   :  { %266 = vsyncpa [#allocation6 + $0x1], 1 }
  0x84   :  { %267 = vsyncpa [#allocation4], 1 }
  0x85   :  { %269 = vsyncpa [#allocation4 + $0x1], 1 }

</bundles_post_ra>
